<compile_context>
chip_gen: v6e
topology: v6e:2x2x1
jax: 0.10.0
libtpu: 0.0.40
codegen_flags: <defaults>
</compile_context>

<pallas_src>
from functools import partial

import numpy as np
import jax
import jax.numpy as jnp
from jax import lax
from jax.experimental import pallas as pl
from jax.experimental.pallas import tpu as pltpu


# ----------------------------------------------------------------------------
# Pallas kernel: one grid step handles Rt = (images_per_block * H) rows of
# lane-fused (W*C) activations.  Image-boundary rows are masked, so blocks made
# of whole images need no halo exchange.
# ----------------------------------------------------------------------------
def _basicblock_kernel(x_ref, mdn_ref, mup_ref, w1_ref, w2_ref,
                       b1_ref, b2_ref, o_ref):
    f32 = jnp.float32
    x = x_ref[...]                         # (Rt, W*Cin) lane-dense, f32
    mdn = mdn_ref[...]                     # (Rt, 1): 0.0 where h == 0
    mup = mup_ref[...]                     # (Rt, 1): 0.0 where h == H-1
    rows = x.shape[0]
    mm_dtype = w1_ref.dtype                # f32 by default; bf16 if requested

    def stack_taps(a):
        # Row h-1 / h+1 via XLU sublane rolls; the mask multiply (VPU) zeroes the
        # image-boundary rows (and fixes the block wrap-around of the roll).
        a_dn = pltpu.roll(a, 1, 0) * mdn          # row r <- row r-1
        a_up = pltpu.roll(a, rows - 1, 0) * mup   # row r <- row r+1
        # K-stack the three ky taps on the lane axis -> one MXU matmul per conv.
        return jnp.concatenate([a_dn, a, a_up], axis=1)   # (Rt, 3*W*C)

    # ---- conv1 (3x3, pad=1) + BN(scale folded) + bias + ReLU ----
    y = jnp.dot(stack_taps(x).astype(mm_dtype), w1_ref[...],
                preferred_element_type=f32)
    y = jnp.maximum(y + b1_ref[...], 0.0)

    # ---- conv2 (3x3, pad=1) + BN(scale folded) + bias ----
    z = jnp.dot(stack_taps(y).astype(mm_dtype), w2_ref[...],
                preferred_element_type=f32)

    # ---- residual add (identity shortcut) + ReLU, f32, unmasked 128-lane store ----
    o_ref[...] = jnp.maximum(z + b2_ref[...] + x, 0.0)


# ----------------------------------------------------------------------------
# Host-side weight / layout preparation (done ONCE, cached as device arrays).
# ----------------------------------------------------------------------------
def _fold_bn(gamma, beta, mean, var, eps=1e-5):
    gamma = np.asarray(gamma, np.float32)
    beta = np.asarray(beta, np.float32)
    mean = np.asarray(mean, np.float32)
    var = np.asarray(var, np.float32)
    scale = gamma / np.sqrt(var + eps)
    bias = beta - mean * scale
    return scale, bias


def _banded_weights_stacked(w_hwio, out_scale, W):
    """Stacked (3*W*Cin, W*Cout) matrix: ky blocks [ky0; ky1; ky2], each encoding
    the kx taps AND the zero padding along W, with BN scale folded in."""
    w = np.asarray(w_hwio, np.float32) * np.asarray(out_scale, np.float32)[None, None, None, :]
    _, _, cin, cout = w.shape
    mats = []
    for ky in range(3):
        B = np.zeros((W * cin, W * cout), np.float32)
        for w_out in range(W):
            for kx in range(3):
                w_in = w_out + kx - 1
                if 0 <= w_in < W:
                    B[w_in * cin:(w_in + 1) * cin,
                      w_out * cout:(w_out + 1) * cout] = w[ky, kx]
        mats.append(B)
    return np.concatenate(mats, axis=0)     # (3*W*cin, W*cout)


def _boundary_masks(images_per_block, H):
    """Per-row masks (Rt, 1): zero the h==0 rows for the down-shift and the
    h==H-1 rows for the up-shift (identical for every block of whole images)."""
    Rt = images_per_block * H
    h = np.arange(Rt) % H
    mdn = (h != 0).astype(np.float32).reshape(Rt, 1)
    mup = (h != H - 1).astype(np.float32).reshape(Rt, 1)
    return mdn, mup


def choose_images_per_block(N, H, target_rows=512):
    """Largest whole-image row block <= target_rows that still yields a grid of
    >= 2 steps (pipelining + both v7x TensorCores).  target_rows=512 keeps the
    per-step working set tiny vs v7x's 64 MiB VMEM."""
    best = 1
    for d in range(1, N + 1):
        if N % d == 0 and d * H <= target_rows and (N < 2 or N // d >= 2):
            best = d
    return best


def prepare_basicblock1(w1_hwio, w2_hwio, bn1, bn2, *, H, W, images_per_block,
                        eps=1e-5, matmul_dtype=jnp.float32):
    """Fold BN, build stacked banded weights / bias rows / boundary masks.
    matmul_dtype=jnp.bfloat16 gives ~2x MXU throughput on v6e/v7x (elementwise
    math stays f32) but will not hold the 1e-4 parity tolerance."""
    cin = int(np.asarray(w1_hwio).shape[2])
    P = int(np.asarray(w1_hwio).shape[3])
    assert cin == P, "identity residual requires in_planes == planes"
    assert (images_per_block * H) % 8 == 0, "row block must be a multiple of 8"

    s1, b1 = _fold_bn(*bn1, eps=eps)
    s2, b2 = _fold_bn(*bn2, eps=eps)
    W1 = _banded_weights_stacked(w1_hwio, s1, W)      # (3*W*cin, W*P)
    W2 = _banded_weights_stacked(w2_hwio, s2, W)      # (3*W*P,   W*P)
    mdn, mup = _boundary_masks(images_per_block, H)

    return dict(
        w1=jnp.asarray(W1, matmul_dtype),
        w2=jnp.asarray(W2, matmul_dtype),
        b1=jnp.asarray(np.tile(b1, W).reshape(1, W * P), jnp.float32),
        b2=jnp.asarray(np.tile(b2, W).reshape(1, W * P), jnp.float32),
        mdn=jnp.asarray(mdn, jnp.float32),
        mup=jnp.asarray(mup, jnp.float32),
    )


# ----------------------------------------------------------------------------
# Jitted apply on the fused (N*H, W*C) layout (preferred entry point).
# ----------------------------------------------------------------------------
@jax.jit
def basicblock1_apply_rows(params, x_rows):
    Rt = params["mdn"].shape[0]                       # rows per grid block
    rows_total, WC = x_rows.shape
    WP = params["w1"].shape[1]
    assert WC == WP, "identity residual requires in_planes == planes"
    assert rows_total % Rt == 0
    num_blocks = rows_total // Rt

    grid_spec = pltpu.PrefetchScalarGridSpec(
        num_scalar_prefetch=0,
        grid=(num_blocks,),
        in_specs=[
            pl.BlockSpec((Rt, WC), lambda g: (g, 0)),        # activation rows
            pl.BlockSpec((Rt, 1), lambda g: (0, 0)),         # mask h!=0   (resident)
            pl.BlockSpec((Rt, 1), lambda g: (0, 0)),         # mask h!=H-1 (resident)
            pl.BlockSpec((3 * WC, WP), lambda g: (0, 0)),    # conv1 stacked weights
            pl.BlockSpec((3 * WP, WP), lambda g: (0, 0)),    # conv2 stacked weights
            pl.BlockSpec((1, WP), lambda g: (0, 0)),         # bn1 bias row
            pl.BlockSpec((1, WP), lambda g: (0, 0)),         # bn2 bias row
        ],
        out_specs=pl.BlockSpec((Rt, WP), lambda g: (g, 0)),
    )

    return pl.pallas_call(
        _basicblock_kernel,
        out_shape=jax.ShapeDtypeStruct((rows_total, WP), jnp.float32),
        grid_spec=grid_spec,
        compiler_params=pltpu.CompilerParams(
            dimension_semantics=("parallel",)),              # shards across v7x TCs
    )(x_rows, params["mdn"], params["mup"], params["w1"], params["w2"],
      params["b1"], params["b2"])


def basicblock1_forward_nchw(params, x_nchw):
    """NCHW convenience wrapper (kept only for PyTorch interface parity; feeding
    the fused (N*H, W*C) layout to basicblock1_apply_rows avoids the extra HBM
    round-trips of these transposes)."""
    N, C, H, W = x_nchw.shape
    x_rows = jnp.transpose(x_nchw, (0, 2, 3, 1)).reshape(N * H, W * C)
    out_rows = basicblock1_apply_rows(params, x_rows)
    P = params["w1"].shape[1] // W
    return jnp.transpose(out_rows.reshape(N, H, W, P), (0, 3, 1, 2))


# ----------------------------------------------------------------------------
# Pure-JAX reference matching the PyTorch forward (eval-mode BN).
# ----------------------------------------------------------------------------
def _ref_forward(x_nchw, w1_hwio, w2_hwio, bn1, bn2, eps=1e-5):
    dn = ("NHWC", "HWIO", "NHWC")
    x = jnp.transpose(x_nchw, (0, 2, 3, 1))

    def bn(y, p):
        g, b, m, v = p
        return (y - m) / jnp.sqrt(v + eps) * g + b

    y = lax.conv_general_dilated(x, w1_hwio, (1, 1), ((1, 1), (1, 1)),
                                 dimension_numbers=dn)
    y = jnp.maximum(bn(y, bn1), 0.0)
    y = lax.conv_general_dilated(y, w2_hwio, (1, 1), ((1, 1), (1, 1)),
                                 dimension_numbers=dn)
    y = bn(y, bn2)
    y = jnp.maximum(y + x, 0.0)
    return jnp.transpose(y, (0, 3, 1, 2))


if __name__ == "__main__":
    # BasicBlock1(in_planes=8, planes=8, stride=1, shortcut=None)
    planes = 8
    in_planes = planes              # identity residual path
    N, H, W = 2, 16, 16             # W * planes = 128 -> exactly lane-dense

    key = jax.random.PRNGKey(0)
    ks = jax.random.split(key, 8)

    x = jax.random.normal(ks[0], (N, in_planes, H, W), jnp.float32)
    w1 = jax.random.normal(ks[1], (3, 3, in_planes, planes), jnp.float32) * 0.2
    w2 = jax.random.normal(ks[2], (3, 3, planes, planes), jnp.float32) * 0.2

    def bn_params(k, c):
        k1, k2, k3, k4 = jax.random.split(k, 4)
        gamma = jax.random.uniform(k1, (c,), jnp.float32, 0.5, 1.5)
        beta = jax.random.normal(k2, (c,), jnp.float32) * 0.1
        mean = jax.random.normal(k3, (c,), jnp.float32) * 0.1
        var = jax.random.uniform(k4, (c,), jnp.float32, 0.5, 1.5)
        return (gamma, beta, mean, var)

    bn1 = bn_params(ks[3], planes)
    bn2 = bn_params(ks[4], planes)

    # One-time host prep; produces a grid of N // ipb = 2 'parallel' blocks here.
    ipb = choose_images_per_block(N, H)
    params = prepare_basicblock1(w1, w2, bn1, bn2, H=H, W=W,
                                 images_per_block=ipb)

    out = jax.block_until_ready(basicblock1_forward_nchw(params, x))
    ref = jax.block_until_ready(_ref_forward(x, w1, w2, bn1, bn2))

    assert out.shape == (N, planes, H, W)
    assert np.allclose(np.asarray(out), np.asarray(ref), atol=1e-4, rtol=1e-4), \
        "Pallas kernel output mismatch vs JAX reference"

    print("KERNEL_OK")
</pallas_src>

<mosaic_0001>
module attributes {stable_mosaic.version = 11 : i64} {
  func.func @_basicblock_kernel(%arg0: i32, %arg1: memref<16x128xf32, #tpu.memory_space<vmem>>, %arg2: memref<16x1xf32, #tpu.memory_space<vmem>>, %arg3: memref<16x1xf32, #tpu.memory_space<vmem>>, %arg4: memref<384x128xf32, #tpu.memory_space<vmem>>, %arg5: memref<384x128xf32, #tpu.memory_space<vmem>>, %arg6: memref<1x128xf32, #tpu.memory_space<vmem>>, %arg7: memref<1x128xf32, #tpu.memory_space<vmem>>, %arg8: memref<16x128xf32, #tpu.memory_space<vmem>>) attributes {dimension_semantics = [#tpu.dimension_semantics<parallel>], iteration_bounds = array<i64: 2>, scalar_prefetch = 0 : i64, scratch_operands = 0 : i64, tpu.core_type = #tpu.core_type<tc>, window_params = [{transform_indices = @transform_0, window_bounds = array<i64: 16, 128>}, {pipeline_mode = #tpu.pipeline_mode<synchronous>, transform_indices = @transform_1, window_bounds = array<i64: 16, 1>}, {pipeline_mode = #tpu.pipeline_mode<synchronous>, transform_indices = @transform_2, window_bounds = array<i64: 16, 1>}, {pipeline_mode = #tpu.pipeline_mode<synchronous>, transform_indices = @transform_3, window_bounds = array<i64: 384, 128>}, {pipeline_mode = #tpu.pipeline_mode<synchronous>, transform_indices = @transform_4, window_bounds = array<i64: 384, 128>}, {pipeline_mode = #tpu.pipeline_mode<synchronous>, transform_indices = @transform_5, window_bounds = array<i64: 1, 128>}, {pipeline_mode = #tpu.pipeline_mode<synchronous>, transform_indices = @transform_6, window_bounds = array<i64: 1, 128>}, {transform_indices = @transform_7, window_bounds = array<i64: 16, 128>}]} {
    %c0 = arith.constant 0 : index
    %c0_0 = arith.constant 0 : index
    %0 = vector.load %arg1[%c0, %c0_0] : memref<16x128xf32, #tpu.memory_space<vmem>>, vector<16x128xf32>
    %c0_1 = arith.constant 0 : index
    %c0_2 = arith.constant 0 : index
    %1 = vector.load %arg2[%c0_1, %c0_2] : memref<16x1xf32, #tpu.memory_space<vmem>>, vector<16x1xf32>
    %c0_3 = arith.constant 0 : index
    %c0_4 = arith.constant 0 : index
    %2 = vector.load %arg3[%c0_3, %c0_4] : memref<16x1xf32, #tpu.memory_space<vmem>>, vector<16x1xf32>
    %c1_i32 = arith.constant 1 : i32
    %3 = tpu.dynamic_rotate %0 by %c1_i32 dim 0 : vector<16x128xf32>, i32 -> vector<16x128xf32>
    %4 = vector.broadcast %1 : vector<16x1xf32> to vector<16x128xf32>
    %5 = arith.mulf %3, %4 : vector<16x128xf32>
    %c15_i32 = arith.constant 15 : i32
    %6 = tpu.dynamic_rotate %0 by %c15_i32 dim 0 : vector<16x128xf32>, i32 -> vector<16x128xf32>
    %7 = vector.broadcast %2 : vector<16x1xf32> to vector<16x128xf32>
    %8 = arith.mulf %6, %7 : vector<16x128xf32>
    %9 = tpu.concatenate %5, %0, %8 in 1 : vector<16x128xf32>, vector<16x128xf32>, vector<16x128xf32> -> vector<16x384xf32>
    %c0_5 = arith.constant 0 : index
    %c0_6 = arith.constant 0 : index
    %10 = vector.load %arg4[%c0_5, %c0_6] : memref<384x128xf32, #tpu.memory_space<vmem>>, vector<384x128xf32>
    %cst = arith.constant dense<0.000000e+00> : vector<16x128xf32>
    %11 = tpu.matmul %9, %10, %cst {dimension_numbers = #tpu.dot_dimension_numbers<[1], [0], [0], [1], [0, 0, 1, 1], [], []>} : vector<16x384xf32>, vector<384x128xf32>, vector<16x128xf32> -> vector<16x128xf32>
    %c0_7 = arith.constant 0 : index
    %c0_8 = arith.constant 0 : index
    %12 = vector.load %arg6[%c0_7, %c0_8] : memref<1x128xf32, #tpu.memory_space<vmem>>, vector<1x128xf32>
    %13 = vector.broadcast %12 : vector<1x128xf32> to vector<16x128xf32>
    %14 = arith.addf %11, %13 : vector<16x128xf32>
    %cst_9 = arith.constant 0.000000e+00 : f32
    %15 = vector.broadcast %cst_9 : f32 to vector<16x128xf32>
    %16 = arith.maximumf %14, %15 : vector<16x128xf32>
    %c1_i32_10 = arith.constant 1 : i32
    %17 = tpu.dynamic_rotate %16 by %c1_i32_10 dim 0 : vector<16x128xf32>, i32 -> vector<16x128xf32>
    %18 = vector.broadcast %1 : vector<16x1xf32> to vector<16x128xf32>
    %19 = arith.mulf %17, %18 : vector<16x128xf32>
    %c15_i32_11 = arith.constant 15 : i32
    %20 = tpu.dynamic_rotate %16 by %c15_i32_11 dim 0 : vector<16x128xf32>, i32 -> vector<16x128xf32>
    %21 = vector.broadcast %2 : vector<16x1xf32> to vector<16x128xf32>
    %22 = arith.mulf %20, %21 : vector<16x128xf32>
    %23 = tpu.concatenate %19, %16, %22 in 1 : vector<16x128xf32>, vector<16x128xf32>, vector<16x128xf32> -> vector<16x384xf32>
    %c0_12 = arith.constant 0 : index
    %c0_13 = arith.constant 0 : index
    %24 = vector.load %arg5[%c0_12, %c0_13] : memref<384x128xf32, #tpu.memory_space<vmem>>, vector<384x128xf32>
    %cst_14 = arith.constant dense<0.000000e+00> : vector<16x128xf32>
    %25 = tpu.matmul %23, %24, %cst_14 {dimension_numbers = #tpu.dot_dimension_numbers<[1], [0], [0], [1], [0, 0, 1, 1], [], []>} : vector<16x384xf32>, vector<384x128xf32>, vector<16x128xf32> -> vector<16x128xf32>
    %c0_15 = arith.constant 0 : index
    %c0_16 = arith.constant 0 : index
    %26 = vector.load %arg7[%c0_15, %c0_16] : memref<1x128xf32, #tpu.memory_space<vmem>>, vector<1x128xf32>
    %27 = vector.broadcast %26 : vector<1x128xf32> to vector<16x128xf32>
    %28 = arith.addf %25, %27 : vector<16x128xf32>
    %29 = arith.addf %28, %0 : vector<16x128xf32>
    %cst_17 = arith.constant 0.000000e+00 : f32
    %30 = vector.broadcast %cst_17 : f32 to vector<16x128xf32>
    %31 = arith.maximumf %29, %30 : vector<16x128xf32>
    %c0_18 = arith.constant 0 : index
    %c0_19 = arith.constant 0 : index
    %32 = vector.load %arg8[%c0_18, %c0_19] : memref<16x128xf32, #tpu.memory_space<vmem>>, vector<16x128xf32>
    tpu.vector_store %arg8[%c0_18, %c0_19], %31 {strides = array<i32>} : memref<16x128xf32, #tpu.memory_space<vmem>>, vector<16x128xf32>,
    return
  }
  func.func @transform_0(%arg0: i32) -> (i32, i32) {
    %c0_i32 = arith.constant 0 : i32
    %c0_i32_0 = arith.constant 0 : i32
    return %arg0, %c0_i32 : i32, i32
  }
  func.func @transform_1(%arg0: i32) -> (i32, i32) {
    %c0_i32 = arith.constant 0 : i32
    %c0_i32_0 = arith.constant 0 : i32
    %c0_i32_1 = arith.constant 0 : i32
    return %c0_i32, %c0_i32_0 : i32, i32
  }
  func.func @transform_2(%arg0: i32) -> (i32, i32) {
    %c0_i32 = arith.constant 0 : i32
    %c0_i32_0 = arith.constant 0 : i32
    %c0_i32_1 = arith.constant 0 : i32
    return %c0_i32, %c0_i32_0 : i32, i32
  }
  func.func @transform_3(%arg0: i32) -> (i32, i32) {
    %c0_i32 = arith.constant 0 : i32
    %c0_i32_0 = arith.constant 0 : i32
    %c0_i32_1 = arith.constant 0 : i32
    return %c0_i32, %c0_i32_0 : i32, i32
  }
  func.func @transform_4(%arg0: i32) -> (i32, i32) {
    %c0_i32 = arith.constant 0 : i32
    %c0_i32_0 = arith.constant 0 : i32
    %c0_i32_1 = arith.constant 0 : i32
    return %c0_i32, %c0_i32_0 : i32, i32
  }
  func.func @transform_5(%arg0: i32) -> (i32, i32) {
    %c0_i32 = arith.constant 0 : i32
    %c0_i32_0 = arith.constant 0 : i32
    %c0_i32_1 = arith.constant 0 : i32
    return %c0_i32, %c0_i32_0 : i32, i32
  }
  func.func @transform_6(%arg0: i32) -> (i32, i32) {
    %c0_i32 = arith.constant 0 : i32
    %c0_i32_0 = arith.constant 0 : i32
    %c0_i32_1 = arith.constant 0 : i32
    return %c0_i32, %c0_i32_0 : i32, i32
  }
  func.func @transform_7(%arg0: i32) -> (i32, i32) {
    %c0_i32 = arith.constant 0 : i32
    %c0_i32_0 = arith.constant 0 : i32
    return %arg0, %c0_i32 : i32, i32
  }
}

</mosaic_0001>

<bundles_post_ra>
// kernel: basicblock1_apply_rows.1
= control target key start
LH: loop header
LB: loop body
LE: loop exit
PB: predicated region body
PF: predicated region fallthrough
CT: control target
= control target key end

     0   :  { %12 = vsyncpa [#allocation3], 0  ;;  %s1532_s0 = inlined_call_operand.vmem [shape: f32[32,128], index: 0, kind: input, shape index: {}]   ;;  %s1533_s1 = inlined_call_operand.vmem [shape: f32[16,1], index: 1, kind: input, shape index: {}]   ;;  %s1534_s2 = inlined_call_operand.vmem [shape: f32[16,1], index: 2, kind: input, shape index: {}]   ;;  %s1535_s3 = inlined_call_operand.hbm [shape: f32[384,128], index: 3, kind: input, shape index: {}]   ;;  %s1536_s4 = inlined_call_operand.hbm [shape: f32[384,128], index: 4, kind: input, shape index: {}]   ;;  %s1537_s5 = inlined_call_operand.vmem [shape: f32[1,128], index: 5, kind: input, shape index: {}]   ;;  %s1538_s6 = inlined_call_operand.vmem [shape: f32[1,128], index: 6, kind: input, shape index: {}]   ;;  %s1539_s7 = inlined_call_operand.hbm [shape: f32[32,128], index: 7, kind: output, shape index: {}]  }
   0x1   :  { %13 = vsyncpa [#allocation6], 0 }
   0x2   :  { %14 = vsyncpa [#allocation4], 0 }
   0x3   :  { %16 = vsyncpa [#allocation4 + $0x1], 0  ;;  %s1318_s24 = smov 0   ;;  %s1320_s25 = smov 0  }
   0x4   :  { %s1322_s26 = smov 0   ;;  %s1324_s27 = smov 0  }
   0x5 LB: > { %s1339_s28 = sadd.s32 4294967295, %s1268_s27   ;;  %s880_s29 = sadd.s32 4294967294, %s1268_s27   ;;  %s1268_s27 = sphi %s1324_s27, %s1554_s27   ;;  %s1264_s26 = sphi %s1322_s26, %s1553_s26   ;;  %s1260_s25 = sphi %s1320_s25, %s1552_s25   ;;  %s1256_s24 = sphi %s1318_s24, %s1551_s24  }
   0x6   : > { %s1343_s30 = sadd.s32 1, %s1268_s27   ;;  %s181_s8 = sadd.s32 1, %s1264_s26 }
   0x7   : > { %s178_s9 = ssub.s32 %s1268_s27, %s1343_s30  ;;  %p191_p0 = scmp.ne.s32.totalorder %s1264_s26, %s1260_s25 }
   0x8   : > { %p179_p1 = scmp.eq.s32.totalorder %s178_s9, 0  ;;  %p192_p2 = scmp.eq.s32.totalorder %s1339_s28, 1 }
   0x9   : > { %p197_p3 = scmp.ne.s32.totalorder %s1260_s25, %s1256_s24  ;;  %p198_p4 = scmp.eq.s32.totalorder %s880_s29, 1 }
   0xa   : > { %s1354_s10 = scalar_select %p179_p1, %s1264_s26, %s181_s8  }
   0xb   : > { %p1356_p5 = por %p192_p2, %p191_p0  ;;  %p1360_p6 = por %p198_p4, %p197_p3 }
   0xc   : > { %p881_p7 = scmp.ge.s32.totalorder %s1268_s27, 1  ;;  %p205_p8 = scmp.lt.s32.totalorder %s1268_s27, 3 }
   0xd   : > { %s1542_s12 = scalar_select %p1360_p6, 1, 0 }
   0xe   : > { %p1540_p9 = scmp.eq.s32.totalorder %s1339_s28, 0  ;;  %p1367_p10 = pnand %p881_p7, %p205_p8 }
   0xf   : > { %s1270_s14 = smov [#allocation2]   ;;  %s1271_s17 = smov [#allocation5]  }
  0x10   : > { %s223_s15 = sshll.u32 %s1270_s14, 4  ;;  %p1091_p11 = pneg %p1367_p10  ;;  %s224_s15 = int_to_ptr.vmem [resolvable:$true] %s223_s15 }
  0x11   : > { %s236_s18 = sshll.u32 %s1271_s17, 4  ;;  %s1159_s19 = scalar_lea.vmem %s224_s15, 6144  ;;  %s237_s18 = int_to_ptr.vmem [resolvable:$true] %s236_s18 }
  0x12   : > { %p1375_p12 = pnand %p1540_p9, %p1091_p11  ;;  %p1160_p0 = scmp.ne.s32.totalorder %s224_s15, %s1159_s19 }
  0x13   : > { %p1167_p3 = scmp.lt.s32.totalorder %s224_s15, %s224_s15  ;;  %p1168_p4 = scmp.lt.s32.totalorder %s1159_s19, %s1159_s19 }
  0x14   : > { %p1150_p13 = pneg %p1375_p12 }
  0x15   : > { %p1169_p7 = por %p1168_p4, %p1167_p3 }
  0x16   : > { %p1162_p1 = pnand %p1160_p0, %p1150_p13 }
  0x18   : > { %p1163_p2 = pneg %p1162_p1 }
  0x1a   : > { %p1170_p8 = pnand %p1169_p7, %p1163_p2 }
  0x1c   : > { %1173 = shalt.err (!%p1170_p8)
}
  0x1d   : > { %s1272_s20 = smov 128   ;;  %s1273_s21 = smov 8  }
  0x1e   : > { %1094 = dma.hbm_to_vmem [thread:$0]  (!%p1375_p12), %s1535_s3, 6144, %s224_s15, [#allocation3], %s1272_s20, %s1272_s20, %s1273_s21  }
  0x1f   : > { %s1185_s29 = scalar_lea.vmem %s237_s18, 6144  ;;  %p1193_p9 = scmp.lt.s32.totalorder %s237_s18, %s237_s18 }
  0x20   : > { %p1186_p11 = scmp.ne.s32.totalorder %s237_s18, %s1185_s29  ;;  %p1194_p6 = scmp.lt.s32.totalorder %s1185_s29, %s1185_s29 }
  0x22   : > { %p1188_p0 = pnand %p1186_p11, %p1150_p13  ;;  %p1195_p3 = por %p1194_p6, %p1193_p9 }
  0x24   : > { %p1189_p1 = pneg %p1188_p0 }
  0x26   : > { %p1196_p2 = pnand %p1195_p3, %p1189_p1 }
  0x28   : > { %1199 = shalt.err (!%p1196_p2)
}
  0x29   : > { %1097 = dma.hbm_to_vmem [thread:$0]  (!%p1375_p12), %s1536_s4, 6144, %s237_s18, [#allocation6], %s1272_s20, %s1272_s20, %s1273_s21  }
  0x2a   : > { %267 = sbr.rel (%p1367_p10) target bundleno = 614 (0x266), region = 48  ;;  %p1545_p4 = scmp.eq.s32.totalorder (!%p1367_p10), %s1339_s28, 0 }
  0x2f   : > { %1243 = dma.done.wait (%p1545_p4), [#allocation3], 6144   ;;  %p1546_p13 = pmov %p1545_p4 }
  0x30   : > { %p1547_p7 = pmov %p1545_p4 }
  0x31   : > { %1245 = vsyncadd (%p1546_p13), [#allocation3], 4294961152 }
  0x32   : > { %1247 = dma.done.wait (%p1547_p7), [#allocation6], 6144   ;;  %p1548_p6 = pmov %p1545_p4 }
  0x33   : > { %v1274_v0 = vmov 0   ;;  %v314_v1 = vld [vmem:[%s1534_s2] sm:$0xff]  ;;  %v383_v3 = vld [vmem:[#allocation2 + $0xf8] sm:$0xff]  ;;  %v315_v5 = vld [vmem:[%s1534_s2 + $0x8] sm:$0xff]  ;;  %s889_s21 = sshll.u32 %s1339_s28, 1  ;;  %v318_v56 = vlaneseq  ;;  %s300_s17 = sand.u32 1, %s1260_s25  }
  0x34   : > { %1249 = vsyncadd (%p1548_p6), [#allocation6], 4294961152  ;;  %1147 = vset.pattern.permute.xlu1 %v1274_v0  ;;  %1146 = vset.pattern.permute.xlu0 %v1274_v0  ;;  %v312_v2 = vld [vmem:[%s1533_s1] sm:$0xff]  ;;  %v367_v4 = vld [vmem:[#allocation2 + $0x78] sm:$0xff]  ;;  %p1420_p9 = scmp.lt.s32.totalorder %s889_s21, 3  ;;  %s888_s18 = sshll.u32 %s300_s17, 4 }
  0x35   : > { %342 = vperm.xlu1 %1147, %v314_v1   ;;  %325 = vperm.xlu0 %1146, %v312_v2   ;;  %v313_v6 = vld [vmem:[%s1533_s1 + $0x8] sm:$0xff]  ;;  %v382_v7 = vld [vmem:[#allocation2 + $0xf0] sm:$0xff]  ;;  %v399_v9 = vld [vmem:[#allocation2 + $0x178] sm:$0xff]  ;;  %v1432_v57 = vshrl.u32 %v318_v56, 7  ;;  %s302_s19 = scalar_lea.vmem [#allocation7], %s888_s18  ;;  %s1492_s8 = scalar_lea.sflag [#allocation4], %s300_s17 }
  0x36   : > { %899 = vmatprep.subr.mxu0 %v383_v3  ;;  %v366_v8 = vld [vmem:[#allocation2 + $0x70] sm:$0xff]  ;;  %v381_v10 = vld [vmem:[#allocation2 + $0xe8] sm:$0xff]  ;;  %1011 = vmatprep.subr.mxu1 %v399_v9  ;;  %v380_v13 = vld [vmem:[#allocation2 + $0xe0] sm:$0xff]  ;;  %s1556_s21 = smov (!%p1420_p9, %s889_s21), 3  ;;  %s796_s20 = sshll.u32 %s302_s19, 4  ;;  %s1485_s20 = int_to_ptr.vmem [resolvable:$true] %s796_s20 }
  0x37   : > { %900 = vmatpush3.msra.mxu0 %v367_v4  ;;  %v398_v11 = vld [vmem:[#allocation2 + $0x170] sm:$0xff]  ;;  %v365_v12 = vld [vmem:[#allocation2 + $0x68] sm:$0xff]  ;;  %1012 = vmatpush3.msra.mxu1 %v399_v9  ;;  %v364_v15 = vld [vmem:[#allocation2 + $0x60] sm:$0xff]  ;;  %s890_s23 = sshll.u32 %s1556_s21, 3  ;;  %vm320_vm0 = vcmp.lt.s32.totalorder %v1432_v57, 1  ;;  %vm337_vm1 = vcmp.lt.s32.totalorder %v1432_v57, 7 }
  0x38   : > { %901 = vmatprep.subr.mxu0 %v382_v7  ;;  %v397_v14 = vld [vmem:[#allocation2 + $0x168] sm:$0xff]  ;;  %1013 = vmatprep.subr.mxu1 %v398_v11  ;;  %v379_v16 = vld [vmem:[#allocation2 + $0xd8] sm:$0xff]  ;;  %v396_v17 = vld [vmem:[#allocation2 + $0x160] sm:$0xff]  ;;  %s307_s9 = scalar_lea.vmem %s1532_s0, %s890_s23  ;;  %s898_s21 = sshll.u32 %s1339_s28, 8 }
  0x39   : > { %347 = vperm.xlu1 %1147, %v315_v5   ;;  %330 = vperm.xlu0 %1146, %v313_v6   ;;  %v363_v18 = vld [vmem:[#allocation2 + $0x58] sm:$0xff]  ;;  %v378_v19 = vld [vmem:[#allocation2 + $0xd0] sm:$0xff]  ;;  %v377_v22 = vld [vmem:[#allocation2 + $0xc8] sm:$0xff]  ;;  %s1490_s29 = scalar_lea.hbm %s1539_s7, %s898_s21  ;;  %s1275_s28 = smov [#allocation7]  }
  0x3a   : > { %902 = vmatpush3.msra.mxu0 %v366_v8  ;;  %1014 = vmatpush3.msra.mxu1 %v398_v11  ;;  %v395_v20 = vld [vmem:[#allocation2 + $0x158] sm:$0xff]  ;;  %v362_v21 = vld [vmem:[#allocation2 + $0x50] sm:$0xff]  ;;  %v361_v24 = vld [vmem:[#allocation2 + $0x48] sm:$0xff]  ;;  %s1204_s14 = sshll.u32 %s1275_s28, 4  ;;  %s1205_s14 = int_to_ptr.vmem [resolvable:$false] %s1204_s14 }
  0x3b   : > { %903 = vmatprep.subr.mxu0 %v381_v10  ;;  %1015 = vmatprep.subr.mxu1 %v397_v14  ;;  %v394_v23 = vld [vmem:[#allocation2 + $0x150] sm:$0xff]  ;;  %v376_v25 = vld [vmem:[#allocation2 + $0xc0] sm:$0xff]  ;;  %v393_v26 = vld [vmem:[#allocation2 + $0x148] sm:$0xff]  ;;  %s1206_s15 = scalar_lea.vmem %s1205_s14, 512  ;;  %p1207_p11 = scmp.lt.s32.totalorder %s1485_s20, %s1205_s14 }
  0x3c   : > { %904 = vmatpush3.msra.mxu0 %v365_v12  ;;  %1016 = vmatpush3.msra.mxu1 %v397_v14  ;;  %v360_v27 = vld [vmem:[#allocation2 + $0x40] sm:$0xff]  ;;  %v375_v28 = vld [vmem:[#allocation2 + $0xb8] sm:$0xff]  ;;  %v374_v31 = vld [vmem:[#allocation2 + $0xb0] sm:$0xff] }
  0x3d   : > { %905 = vmatprep.subr.mxu0 %v380_v13  ;;  %1017 = vmatprep.subr.mxu1 %v396_v17  ;;  %v392_v29 = vld [vmem:[#allocation2 + $0x140] sm:$0xff]  ;;  %v359_v30 = vld [vmem:[#allocation2 + $0x38] sm:$0xff]  ;;  %v358_v33 = vld [vmem:[#allocation2 + $0x30] sm:$0xff] }
  0x3e   : > { %906 = vmatpush3.msra.mxu0 %v364_v15  ;;  %1018 = vmatpush3.msra.mxu1 %v396_v17  ;;  %v391_v32 = vld [vmem:[#allocation2 + $0x138] sm:$0xff]  ;;  %v373_v34 = vld [vmem:[#allocation2 + $0xa8] sm:$0xff]  ;;  %v390_v35 = vld [vmem:[#allocation2 + $0x130] sm:$0xff] }
  0x3f   : > { %907 = vmatprep.subr.mxu0 %v379_v16  ;;  %1019 = vmatprep.subr.mxu1 %v395_v20  ;;  %v357_v36 = vld [vmem:[#allocation2 + $0x28] sm:$0xff]  ;;  %v372_v37 = vld [vmem:[#allocation2 + $0xa0] sm:$0xff]  ;;  %v371_v40 = vld [vmem:[#allocation2 + $0x98] sm:$0xff] }
  0x40   : > { %908 = vmatpush3.msra.mxu0 %v363_v18  ;;  %1020 = vmatpush3.msra.mxu1 %v395_v20  ;;  %v389_v38 = vld [vmem:[#allocation2 + $0x128] sm:$0xff]  ;;  %v356_v39 = vld [vmem:[#allocation2 + $0x20] sm:$0xff]  ;;  %v355_v42 = vld [vmem:[#allocation2 + $0x18] sm:$0xff] }
  0x41   : > { %909 = vmatprep.subr.mxu0 %v378_v19  ;;  %1021 = vmatprep.subr.mxu1 %v394_v23  ;;  %v388_v41 = vld [vmem:[#allocation2 + $0x120] sm:$0xff]  ;;  %v370_v43 = vld [vmem:[#allocation2 + $0x90] sm:$0xff]  ;;  %v387_v44 = vld [vmem:[#allocation2 + $0x118] sm:$0xff] }
  0x42   : > { %910 = vmatpush3.msra.mxu0 %v362_v21  ;;  %1022 = vmatpush3.msra.mxu1 %v394_v23  ;;  %v354_v45 = vld [vmem:[#allocation2 + $0x10] sm:$0xff]  ;;  %v369_v46 = vld [vmem:[#allocation2 + $0x88] sm:$0xff]  ;;  %v368_v49 = vld [vmem:[#allocation2 + $0x80] sm:$0xff] }
  0x43   : > { %911 = vmatprep.subr.mxu0 %v377_v22  ;;  %1023 = vmatprep.subr.mxu1 %v393_v26  ;;  %v386_v47 = vld [vmem:[#allocation2 + $0x110] sm:$0xff]  ;;  %v353_v48 = vld [vmem:[#allocation2 + $0x8] sm:$0xff]  ;;  %v1429_v50 = vld [vmem:[%s307_s9] sm:$0xff] }
  0x44   : > { %912 = vmatpush3.msra.mxu0 %v361_v24  ;;  %1024 = vmatpush3.msra.mxu1 %v393_v26  ;;  %v352_v51 = vld [vmem:[#allocation2] sm:$0xff]  ;;  %v385_v52 = vld [vmem:[#allocation2 + $0x108] sm:$0xff]  ;;  %v602_v53 = vld [vmem:[#allocation5 + $0xf8] sm:$0xff]  ;;  %v316_v59 = vrot.slane %v1429_v50, 7  ;;  %v335_v61 = vrot.slane %v1429_v50, 1 }
  0x45   : > { %913 = vmatprep.subr.mxu0 %v376_v25  ;;  %1025 = vmatprep.subr.mxu1 %v392_v29  ;;  %v384_v54 = vld [vmem:[#allocation2 + $0x100] sm:$0xff]  ;;  %v618_v55 = vld [vmem:[#allocation5 + $0x178] sm:$0xff]  ;;  %v1434_v58 = vld [vmem:[%s307_s9 + $0x8] sm:$0xff]  ;;  %s1200_s9 = scalar_lea.vmem %s1485_s20, 256 }
  0x46   : > { %914 = vmatpush3.msra.mxu0 %v360_v27  ;;  %1026 = vmatpush3.msra.mxu1 %v392_v29  ;;  %v317_v60 = vrot.slane %v1434_v58, 7  ;;  %v336_v62 = vrot.slane %v1434_v58, 1  ;;  %v586_v5 = vld [vmem:[#allocation5 + $0x78] sm:$0xff]  ;;  %v601_v8 = vld [vmem:[#allocation5 + $0xf0] sm:$0xff]  ;;  %v600_v14 = vld [vmem:[#allocation5 + $0xe8] sm:$0xff]  ;;  %p1201_p10 = scmp.ne.s32.totalorder %s1485_s20, %s1200_s9  ;;  %p1208_p0 = scmp.lt.s32.totalorder %s1206_s15, %s1200_s9 }
  0x47   : > { %915 = vmatprep.subr.mxu0 %v375_v28  ;;  %1027 = vmatprep.subr.mxu1 %v391_v32  ;;  %v585_v9 = vld [vmem:[#allocation5 + $0x70] sm:$0xff]  ;;  %v584_v16 = vld [vmem:[#allocation5 + $0x68] sm:$0xff]  ;;  %v599_v17 = vld [vmem:[#allocation5 + $0xe0] sm:$0xff] }
  0x48   : > { %916 = vmatpush3.msra.mxu0 %v359_v30  ;;  %1028 = vmatpush3.msra.mxu1 %v391_v32  ;;  %v322_v63 = vsel %vm320_vm0, %v317_v60, %v316_v59  ;;  %v338_v0 = vsel %vm337_vm1, %v335_v61, %v336_v62  ;;  %v339_v6 = vsel %vm337_vm1, %v336_v62, %v335_v61  ;;  %v617_v15 = vld [vmem:[#allocation5 + $0x170] sm:$0xff]  ;;  %v616_v18 = vld [vmem:[#allocation5 + $0x168] sm:$0xff]  ;;  %v583_v19 = vld [vmem:[#allocation5 + $0x60] sm:$0xff]  ;;  %p1202_p12 = pnand %p1201_p10, %p1356_p5  ;;  %p1209_p1 = por %p1208_p0, %p1207_p11 }
  0x49   : > { %917 = vmatprep.subr.mxu0 %v374_v31  ;;  %1029 = vmatprep.subr.mxu1 %v390_v35  ;;  %v321_v7 = vsel %vm320_vm0, %v316_v59, %v317_v60  ;;  %v598_v20 = vld [vmem:[#allocation5 + $0xd8] sm:$0xff]  ;;  %v615_v21 = vld [vmem:[#allocation5 + $0x160] sm:$0xff]  ;;  %v597_v23 = vld [vmem:[#allocation5 + $0xd0] sm:$0xff] }
  0x4a   : > { %918 = vmatpush3.msra.mxu0 %v358_v33  ;;  %1030 = vmatpush3.msra.mxu1 %v390_v35  ;;  %v582_v22 = vld [vmem:[#allocation5 + $0x58] sm:$0xff]  ;;  %v581_v25 = vld [vmem:[#allocation5 + $0x50] sm:$0xff]  ;;  %v596_v27 = vld [vmem:[#allocation5 + $0xc8] sm:$0xff]  ;;  %p1203_p8 = pneg %p1202_p12 }
  0x4b   : > { %919 = vmatprep.subr.mxu0 %v373_v34  ;;  %1031 = vmatprep.subr.mxu1 %v389_v38  ;;  %v614_v24 = vld [vmem:[#allocation5 + $0x158] sm:$0xff]  ;;  %v613_v26 = vld [vmem:[#allocation5 + $0x150] sm:$0xff]  ;;  %v580_v28 = vld [vmem:[#allocation5 + $0x48] sm:$0xff] }
  0x4c   : > { %920 = vmatpush3.msra.mxu0 %v357_v36  ;;  %1032 = vmatpush3.msra.mxu1 %v389_v38  ;;  %v612_v29 = vld [vmem:[#allocation5 + $0x148] sm:$0xff]  ;;  %v595_v30 = vld [vmem:[#allocation5 + $0xc0] sm:$0xff]  ;;  %v594_v33 = vld [vmem:[#allocation5 + $0xb8] sm:$0xff]  ;;  %p1210_p3 = pnand %p1209_p1, %p1203_p8 }
  0x4d   : > { %921 = vmatprep.subr.mxu0 %v372_v37  ;;  %1033 = vmatprep.subr.mxu1 %v388_v41  ;;  %v579_v31 = vld [vmem:[#allocation5 + $0x40] sm:$0xff]  ;;  %v578_v34 = vld [vmem:[#allocation5 + $0x38] sm:$0xff]  ;;  %v593_v36 = vld [vmem:[#allocation5 + $0xb0] sm:$0xff] }
  0x4e   : > { %922 = vmatpush3.msra.mxu0 %v356_v39  ;;  %1034 = vmatpush3.msra.mxu1 %v388_v41  ;;  %v611_v32 = vld [vmem:[#allocation5 + $0x140] sm:$0xff]  ;;  %v610_v35 = vld [vmem:[#allocation5 + $0x138] sm:$0xff]  ;;  %v577_v37 = vld [vmem:[#allocation5 + $0x30] sm:$0xff] }
  0x4f   : > { %923 = vmatprep.subr.mxu0 %v371_v40  ;;  %1035 = vmatprep.subr.mxu1 %v387_v44  ;;  %v609_v38 = vld [vmem:[#allocation5 + $0x130] sm:$0xff]  ;;  %v592_v39 = vld [vmem:[#allocation5 + $0xa8] sm:$0xff]  ;;  %v571_v56 = vld [vmem:[#allocation5] sm:$0xff] }
  0x50   : > { %924 = vmatpush3.msra.mxu0 %v355_v42  ;;  %1036 = vmatpush3.msra.mxu1 %v387_v44  ;;  %v576_v40 = vld [vmem:[#allocation5 + $0x28] sm:$0xff]  ;;  %v591_v42 = vld [vmem:[#allocation5 + $0xa0] sm:$0xff] }
  0x51   : > { %925 = vmatprep.subr.mxu0 %v370_v43  ;;  %1037 = vmatprep.subr.mxu1 %v386_v47  ;;  %v608_v41 = vld [vmem:[#allocation5 + $0x128] sm:$0xff]  ;;  %v575_v43 = vld [vmem:[#allocation5 + $0x20] sm:$0xff] }
  0x52   : > { %926 = vmatpush3.msra.mxu0 %v354_v45  ;;  %471 = vmatprep.mubr.f32.mxu0 %v1429_v50  ;;  %v607_v44 = vld [vmem:[#allocation5 + $0x120] sm:$0xff]  ;;  %v590_v45 = vld [vmem:[#allocation5 + $0x98] sm:$0xff] }
  0x53   : > { %927 = vmatprep.subr.mxu0 %v369_v46  ;;  %1038 = vmatpush3.msra.mxu1 %v386_v47  ;;  %v574_v46 = vld [vmem:[#allocation5 + $0x18] sm:$0xff]  ;;  %v603_v59 = vld [vmem:[#allocation5 + $0x100] sm:$0xff] }
  0x54   : > { %928 = vmatpush3.msra.mxu0 %v353_v48  ;;  %1039 = vmatprep.subr.mxu1 %v385_v52  ;;  %v606_v47 = vld [vmem:[#allocation5 + $0x118] sm:$0xff]  ;;  %v589_v48 = vld [vmem:[#allocation5 + $0x90] sm:$0xff]  ;;  %v891_v62 = vld [vmem:[%s1537_s5] ss:$0 sm:$0xff] }
  0x55   : > { %929 = vmatprep.subr.mxu0 %v368_v49  ;;  %1040 = vmatpush3.msra.mxu1 %v385_v52  ;;  %v573_v49 = vld [vmem:[#allocation5 + $0x10] sm:$0xff]  ;;  %v588_v52 = vld [vmem:[#allocation5 + $0x88] sm:$0xff] }
  0x56   : > { %930 = vmatpush3.msra.mxu0 %v352_v51  ;;  %1041 = vmatprep.subr.mxu1 %v384_v54  ;;  %v605_v51 = vld [vmem:[#allocation5 + $0x110] sm:$0xff] }
  0x57   : > { %955 = vmatprep.subr.mxu0 %v602_v53  ;;  %1042 = vmatpush3.msra.mxu1 %v384_v54  ;;  %v572_v53 = vld [vmem:[#allocation5 + $0x8] sm:$0xff] }
  0x58   : > { %1046 = vmatprep.subr.mxu1 %v618_v55  ;;  %v604_v54 = vld [vmem:[#allocation5 + $0x108] sm:$0xff] }
  0xb0   : > { %v1446_v1 = vpop.permute.xlu1 %342  ;;  %v1448_v2 = vpop.permute.xlu0 %325 }
  0xb1   : > { %v333_v3 = vmul.f32 %v1448_v2, %v322_v63  ;;  %v350_v4 = vmul.f32 %v1446_v1, %v338_v0 }
  0xb3   : > { %472 = vmatmul.mubr.f32.vlgmr.msra.gmra.mxu0 %v333_v3  ;;  %1043 = vmatprep.mubr.f32.mxu1 %v350_v4 }
  0xb4   : > { %v1456_v10 = vpop.permute.xlu1 %347  ;;  %v1458_v11 = vpop.permute.xlu0 %330  ;;  %476 = vmatprep.mubr.f32.mxu0 %v1434_v58  ;;  %956 = vmatpush3.msra.mxu0 %v586_v5 }
  0xb5   : > { %v351_v12 = vmul.f32 %v1456_v10, %v339_v6  ;;  %v334_v13 = vmul.f32 %v1458_v11, %v321_v7  ;;  %957 = vmatprep.subr.mxu0 %v601_v8 }
  0xb6   : > { %958 = vmatpush3.msra.mxu0 %v585_v9 }
  0xb7   : > { %477 = vmatmul.mubr.f32.gmra.mxu0 %v334_v13  ;;  %1044 = vmatmul.mubr.f32.vlgmr.msra.gmra.mxu1 %v351_v12 }
  0xb8   : > { %1047 = vmatpush3.msra.mxu1 %v618_v55  ;;  %959 = vmatprep.subr.mxu0 %v600_v14  ;;  %v587_v55 = vld [vmem:[#allocation5 + $0x80] sm:$0xff] }
  0xb9   : > { %1048 = vmatprep.subr.mxu1 %v617_v15  ;;  %960 = vmatpush3.msra.mxu0 %v584_v16 }
  0xba   : > { %1049 = vmatpush3.msra.mxu1 %v617_v15  ;;  %961 = vmatprep.subr.mxu0 %v599_v17 }
  0xbb   : > { %1050 = vmatprep.subr.mxu1 %v616_v18  ;;  %962 = vmatpush3.msra.mxu0 %v583_v19 }
  0xbc   : > { %1051 = vmatpush3.msra.mxu1 %v616_v18  ;;  %963 = vmatprep.subr.mxu0 %v598_v20 }
  0xbd   : > { %1052 = vmatprep.subr.mxu1 %v615_v21  ;;  %964 = vmatpush3.msra.mxu0 %v582_v22 }
  0xbe   : > { %1053 = vmatpush3.msra.mxu1 %v615_v21  ;;  %965 = vmatprep.subr.mxu0 %v597_v23 }
  0xbf   : > { %1054 = vmatprep.subr.mxu1 %v614_v24  ;;  %966 = vmatpush3.msra.mxu0 %v581_v25 }
  0xc0   : > { %1055 = vmatpush3.msra.mxu1 %v614_v24  ;;  %967 = vmatprep.subr.mxu0 %v596_v27 }
  0xc1   : > { %1056 = vmatprep.subr.mxu1 %v613_v26  ;;  %968 = vmatpush3.msra.mxu0 %v580_v28 }
  0xc2   : > { %1057 = vmatpush3.msra.mxu1 %v613_v26  ;;  %969 = vmatprep.subr.mxu0 %v595_v30 }
  0xc3   : > { %1058 = vmatprep.subr.mxu1 %v612_v29  ;;  %970 = vmatpush3.msra.mxu0 %v579_v31 }
  0xc4   : > { %1059 = vmatpush3.msra.mxu1 %v612_v29  ;;  %971 = vmatprep.subr.mxu0 %v594_v33 }
  0xc5   : > { %1060 = vmatprep.subr.mxu1 %v611_v32  ;;  %972 = vmatpush3.msra.mxu0 %v578_v34 }
  0xc6   : > { %1061 = vmatpush3.msra.mxu1 %v611_v32  ;;  %973 = vmatprep.subr.mxu0 %v593_v36 }
  0xc7   : > { %1062 = vmatprep.subr.mxu1 %v610_v35  ;;  %974 = vmatpush3.msra.mxu0 %v577_v37 }
  0xc8   : > { %1063 = vmatpush3.msra.mxu1 %v610_v35  ;;  %975 = vmatprep.subr.mxu0 %v592_v39 }
  0xc9   : > { %1064 = vmatprep.subr.mxu1 %v609_v38  ;;  %976 = vmatpush3.msra.mxu0 %v576_v40 }
  0xca   : > { %1065 = vmatpush3.msra.mxu1 %v609_v38  ;;  %977 = vmatprep.subr.mxu0 %v591_v42 }
  0xcb   : > { %1066 = vmatprep.subr.mxu1 %v608_v41  ;;  %978 = vmatpush3.msra.mxu0 %v575_v43 }
  0xcc   : > { %1067 = vmatpush3.msra.mxu1 %v608_v41  ;;  %979 = vmatprep.subr.mxu0 %v590_v45 }
  0xcd   : > { %1068 = vmatprep.subr.mxu1 %v607_v44  ;;  %980 = vmatpush3.msra.mxu0 %v574_v46 }
  0xce   : > { %1069 = vmatpush3.msra.mxu1 %v607_v44  ;;  %981 = vmatprep.subr.mxu0 %v589_v48 }
  0xcf   : > { %1070 = vmatprep.subr.mxu1 %v606_v47  ;;  %982 = vmatpush3.msra.mxu0 %v573_v49 }
  0xd0   : > { %1071 = vmatpush3.msra.mxu1 %v606_v47  ;;  %983 = vmatprep.subr.mxu0 %v588_v52 }
  0xd1   : > { %1072 = vmatprep.subr.mxu1 %v605_v51  ;;  %984 = vmatpush3.msra.mxu0 %v572_v53 }
  0xd2   : > { %1073 = vmatpush3.msra.mxu1 %v605_v51  ;;  %985 = vmatprep.subr.mxu0 %v587_v55 }
  0xd3   : > { %1074 = vmatprep.subr.mxu1 %v604_v54  ;;  %986 = vmatpush3.msra.mxu0 %v571_v56 }
  0xd4   : > { %1075 = vmatpush3.msra.mxu1 %v604_v54 }
  0xd5   : > { %1076 = vmatprep.subr.mxu1 %v603_v59 }
  0xd6   : > { %1077 = vmatpush3.msra.mxu1 %v603_v59 }
 0x173   : > { %v931_v60 = vpop.f32.mrf.mxu0 }
 0x175   : > { %v932_v61 = vpop.f32.mrf.mxu0 }
 0x176   : > { %v933_v63 = vadd.f32 %v932_v61, %v931_v60 }
 0x177   : > { %v934_v0 = vpop.f32.mrf.mxu0  ;;  %v1045_v3 = vpop.f32.mrf.mxu1 }
 0x178   : > { %v474_v4 = vadd.f32 %v933_v63, %v891_v62 }
 0x179   : > { %v935_v5 = vpop.f32.mrf.mxu0  ;;  %v548_v6 = vpop.f32.mrf.mxu1 }
 0x17a   : > { %v936_v7 = vadd.f32 %v935_v5, %v934_v0  ;;  %v549_v8 = vadd.f32 %v548_v6, %v474_v4 }
 0x17c   : > { %v479_v9 = vadd.f32 %v936_v7, %v891_v62  ;;  %v557_v12 = vmax.f32 %v549_v8, 0.0 }
 0x17e   : > { %v554_v13 = vadd.f32 %v1045_v3, %v479_v9  ;;  %690 = vmatprep.mubr.f32.mxu0 %v557_v12  ;;  %v559_v16 = vrot.slane %v557_v12, 7  ;;  %v565_v17 = vrot.slane %v557_v12, 1 }
 0x180   : > { %v558_v14 = vmax.f32 %v554_v13, 0.0 }
 0x182   : > { %v560_v15 = vrot.slane %v558_v14, 7  ;;  %v566_v18 = vrot.slane %v558_v14, 1 }
 0x184   : > { %v562_v19 = vsel %vm320_vm0, %v560_v15, %v559_v16  ;;  %v567_v20 = vsel %vm337_vm1, %v565_v17, %v566_v18  ;;  %v568_v21 = vsel %vm337_vm1, %v566_v18, %v565_v17  ;;  %v561_v25 = vsel %vm320_vm0, %v559_v16, %v560_v15 }
 0x185   : > { %v563_v22 = vmul.f32 %v562_v19, %v1448_v2  ;;  %v569_v23 = vmul.f32 %v567_v20, %v1446_v1  ;;  %v570_v24 = vmul.f32 %v568_v21, %v1456_v10  ;;  %v564_v26 = vmul.f32 %v561_v25, %v1458_v11  ;;  %v892_v2 = vld [vmem:[%s1538_s6] ss:$0 sm:$0xff] }
 0x187   : > { %691 = vmatmul.mubr.f32.vlgmr.msra.gmra.mxu0 %v563_v22  ;;  %1078 = vmatprep.mubr.f32.mxu1 %v569_v23 }
 0x188   : > { %695 = vmatprep.mubr.f32.mxu0 %v558_v14  ;;  %1079 = vmatmul.mubr.f32.vlgmr.msra.gmra.mxu1 %v570_v24 }
 0x18b   : > { %696 = vmatmul.mubr.f32.gmra.mxu0 %v564_v26 }
 0x247   : > { %v987_v27 = vpop.f32.mrf.mxu0 }
 0x248   : > { %v1080_v28 = vpop.f32.mrf.mxu1 }
 0x249   : > { %v988_v29 = vpop.f32.mrf.mxu0 }
 0x24a   : > { %v989_v1 = vadd.f32 %v988_v29, %v987_v27  ;;  %v767_v30 = vpop.f32.mrf.mxu1 }
 0x24b   : > { %v990_v10 = vpop.f32.mrf.mxu0 }
 0x24c   : > { %v693_v57 = vadd.f32 %v989_v1, %v892_v2 }
 0x24d   : > { %v991_v31 = vpop.f32.mrf.mxu0 }
 0x24e   : > { %v768_v32 = vadd.f32 %v767_v30, %v693_v57  ;;  %v992_v33 = vadd.f32 %v991_v31, %v990_v10 }
 0x250   : > { %v776_v11 = vadd.f32 %v768_v32, %v1429_v50  ;;  %v698_v34 = vadd.f32 %v992_v33, %v892_v2 }
 0x252   : > { %v778_v35 = vmax.f32 %v776_v11, 0.0  ;;  %v773_v36 = vadd.f32 %v1080_v28, %v698_v34 }
 0x254   : > { %780 = vst [vmem:[%s302_s19] sm:$0xff] %v778_v35  ;;  %v777_v37 = vadd.f32 %v773_v36, %v1434_v58 }
 0x256   : > { %v779_v50 = vmax.f32 %v777_v37, 0.0 }
 0x258   : > { %781 = vst [vmem:[%s302_s19 + $0x8] sm:$0xff] %v779_v50 }
 0x259   : > { %1213 = shalt.err (!%p1210_p3)
}
 0x25a   : > { %s1214_s13 = scalar_lea.hbm %s1490_s29, 256  ;;  %s1218_s18 = scalar_lea.hbm %s1539_s7, 512 }
 0x25b   : > { %p1215_p2 = scmp.ne.s32.totalorder %s1490_s29, %s1214_s13  ;;  %p1219_p7 = scmp.lt.s32.totalorder %s1490_s29, %s1539_s7 }
 0x25c   : > { %p1220_p6 = scmp.lt.s32.totalorder %s1218_s18, %s1214_s13 }
 0x25d   : > { %p1216_p4 = pnand %p1215_p2, %p1356_p5 }
 0x25e   : > { %p1221_p9 = por %p1220_p6, %p1219_p7 }
 0x25f   : > { %p1217_p13 = pneg %p1216_p4 }
 0x261   : > { %p1222_p10 = pnand %p1221_p9, %p1217_p13 }
 0x263   : > { %1225 = shalt.err (!%p1222_p10)
}
 0x264   : > { %s1276_s22 = smov 128   ;;  %s1277_s23 = smov 8  }
 0x265   : > { %1089 = dma.vmem_to_hbm [thread:$0]  (%p1356_p5), %s1485_s20, 256, %s1490_s29, %s1492_s8, %s1276_s22, %s1276_s22, %s1277_s23  }
 0x266 PF: > { %p1106_p12 = scmp.ge.s32.totalorder %s1268_s27, 2  ;;  %s811_s9 = sand.u32 1, %s1256_s24  }
 0x267   : > { %p1550_p8 = scmp.ne.s32.totalorder %s1542_s12, 0  ;;  %s812_s28 = scalar_lea.sflag [#allocation4], %s811_s9 }
 0x269   : > { %p1099_p11 = pnand %p1106_p12, %p1550_p8 }
 0x26b   : > { %p1100_p0 = pneg %p1099_p11 }
 0x26d   : > { %1251 = dma.done.wait (%p1100_p0), %s812_s28, 256  }
 0x26e   : > { %1253 = vsyncadd (%p1100_p0), %s812_s28, 4294967040  ;;  %p19_p1 = scmp.ge.s32.totalorder %s1343_s30, 4   ;;  %s1551_s24 = smov %s1260_s25 }
 0x26f   : > { %s1552_s25 = smov %s1264_s26  ;;  %s1553_s26 = smov %s1354_s10 }
 0x270   : > { %s1554_s27 = smov %s1343_s30  ;;  %21 = sbr.rel (!%p19_p1) target bundleno = 5 (0x5), region = 92 }
 0x275   :  { %817 = vsyncpa [#allocation3], 1 }
 0x276   :  { %819 = vsyncpa [#allocation3 + $0x1], 1 }
 0x277   :  { %820 = vsyncpa [#allocation6], 1 }
 0x278   :  { %821 = vsyncpa [#allocation4], 1 }
 0x279   :  { %823 = vsyncpa [#allocation4 + $0x1], 1 }

</bundles_post_ra>
